<compile_context>
chip_gen: v5e
topology: v5e:2x2
jax: 0.10.0
libtpu: 0.0.40
codegen_flags: <defaults>
</compile_context>

<pallas_src>
import jax
import jax.numpy as jnp
from jax import lax
from jax.experimental import pallas as pl
from jax.experimental.pallas import tpu as pltpu


def _cdiv(a, b):
    return -(-a // b)


def _make_sse_kernel(R, rows_valid, need_row_mask):
    """Build the streaming per-sample sum-of-squared-errors kernel.

    Grid: (GB, K).  Axis 0 tiles the batch ('parallel', megacore-shardable);
    axis 1 walks chunks of the (rows, 128)-shaped feature dim ('arbitrary',
    reduction, last).
      pred_ref / tgt_ref : (Bt, R, 128) tile
      acc_ref            : (Bt, 128) f32 resident per-sample lane partials
      out_ref            : (Bt, 128), written on the last k only
    """

    def kernel(pred_ref, tgt_ref, out_ref, acc_ref):
        k = pl.program_id(1)

        @pl.when(k == 0)
        def _():
            acc_ref[...] = jnp.zeros_like(acc_ref)

        diff = pred_ref[...].astype(jnp.float32) - tgt_ref[...].astype(jnp.float32)
        sq = diff * diff                                      # (Bt, R, 128)
        if need_row_mask:
            # The last feature chunk overruns the true row count: zero the
            # tail with a select (not a multiply) so garbage inf/NaN from the
            # out-of-bounds block region cannot leak into valid sums.
            r_idx = k * R + lax.broadcasted_iota(jnp.int32, sq.shape, 1)
            sq = jnp.where(r_idx < rows_valid, sq, 0.0)
        # Row-axis reduce per sample: cross-vreg VPU adds plus one sublane
        # reduce per tile.  The kernel is HBM-bandwidth-bound, so this never
        # becomes the binding slot.
        acc_ref[...] += jnp.sum(sq, axis=1)                   # (Bt, 128)

        @pl.when(k == pl.num_programs(1) - 1)
        def _():
            out_ref[...] = acc_ref[...]

    return kernel


def _per_sample_sse_pallas(pred2, tgt2, *, target_step_bytes):
    """Per-sample sum of squared errors via a streaming Pallas reduction.

    pred2 / tgt2: (B, D) in their stored dtype (kernel upcasts to f32).
    Returns (B,) float32 SSE (not yet divided by D).
    """
    B, D = pred2.shape
    itemsize = pred2.dtype.itemsize

    rows = _cdiv(D, 128)
    Dp = rows * 128
    if Dp != D:
        # Rare (typical diffusion shapes are multiples of 128).  The zero pad
        # contributes nothing to the SSE; D (not Dp) normalizes later.  A pure
        # in-kernel lane mask cannot be combined with the free (B, rows, 128)
        # reshape, so we accept the extra copy only on this path.
        pred2 = jnp.pad(pred2, ((0, 0), (0, Dp - D)))
        tgt2 = jnp.pad(tgt2, ((0, 0), (0, Dp - D)))
    pred3 = pred2.reshape(B, rows, 128)   # contiguous reshape: no HBM copy
    tgt3 = tgt2.reshape(B, rows, 128)

    # --- Tile selection -----------------------------------------------------
    # Move ~target_step_bytes (both inputs combined) per grid step so the
    # per-step pipeline overhead (~0.35us) stays hidden on v5e/v6e/v7x.
    # Double-buffered VMEM footprint: 2 inputs x 2 buffers x (target/2)
    # ~= 2 x target, kept well under the 48 MiB limit requested below
    # (v7x has 64 MiB physical VMEM per TensorCore).
    rows_budget = max(8, target_step_bytes // (2 * 128 * itemsize))
    if rows <= rows_budget:
        # A whole sample fits in one step: tile the batch (the big win for
        # typical diffusion latents/images, where one sample is tiny).
        R = rows                      # equals the full array dim -> rule OK
        K = 1
        Bt = max(1, min(B, rows_budget // rows))
        if Bt != B and Bt > 8:
            Bt = (Bt // 8) * 8        # sublane-dense output stores
    else:
        # A single sample exceeds the step budget: stream its rows.
        Bt = 1
        R = max(8, (rows_budget // 8) * 8)   # multiple of 8 (block-shape rule)
        K = _cdiv(rows, R)
    GB = _cdiv(B, Bt)
    need_row_mask = (rows % R) != 0          # only possible when K > 1

    bytes_in = 2 * B * Dp * itemsize
    bytes_out = GB * Bt * 128 * 4

    lane_partials = pl.pallas_call(
        _make_sse_kernel(R, rows, need_row_mask),
        out_shape=jax.ShapeDtypeStruct((GB, Bt, 128), jnp.float32),
        grid_spec=pltpu.PrefetchScalarGridSpec(
            num_scalar_prefetch=0,
            grid=(GB, K),
            in_specs=[
                pl.BlockSpec((Bt, R, 128), lambda b, k: (b, k, 0)),
                pl.BlockSpec((Bt, R, 128), lambda b, k: (b, k, 0)),
            ],
            # 3-D output with the batch tile as the (full) second-minor dim:
            # sublane-dense, and the (8,128) block rule is satisfied for any Bt.
            out_specs=pl.BlockSpec((None, Bt, 128), lambda b, k: (b, 0, 0)),
            scratch_shapes=[pltpu.VMEM((Bt, 128), jnp.float32)],
        ),
        compiler_params=pltpu.CompilerParams(
            # Batch axis parallel (megacore on v7x), reduction axis last.
            dimension_semantics=("parallel", "arbitrary"),
            vmem_limit_bytes=48 * 1024 * 1024),
        cost_estimate=pl.CostEstimate(
            flops=3 * B * Dp,
            transcendentals=0,
            bytes_accessed=bytes_in + bytes_out),
    )(pred3, tgt3)

    # Drop the (tiny) batch padding rows, then reduce lanes in plain JAX.
    lane_partials = lane_partials.reshape(GB * Bt, 128)[:B]
    return jnp.sum(lane_partials, axis=-1)                    # (B,) SSE


def vlb_loss(predicted_noise, target_noise, timesteps, x_0, x_t,
             alphas_cumprod, betas, *,
             use_kernel=None,
             target_step_bytes=8 * 1024 * 1024,
             small_bytes_threshold=512 * 1024):
    """VLB loss matching the PyTorch reference forward pass."""
    # x_0 / x_t are unused by the reference forward; kept for signature parity.
    del x_0, x_t

    B = predicted_noise.shape[0]
    pred2 = predicted_noise.reshape(B, -1)
    tgt2 = target_noise.reshape(B, -1)
    D = pred2.shape[1]

    total_bytes = 2 * B * D * pred2.dtype.itemsize
    if use_kernel is None:
        # Tiny problems: kernel launch + pipeline overhead exceeds the math;
        # the XLA fusion is as fast or faster.
        use_kernel = total_bytes >= small_bytes_threshold

    if use_kernel:
        sse = _per_sample_sse_pallas(pred2, tgt2,
                                     target_step_bytes=target_step_bytes)
        mse = sse / jnp.float32(D)
    else:
        diff = pred2.astype(jnp.float32) - tgt2.astype(jnp.float32)
        mse = jnp.mean(diff * diff, axis=1)

    # Tiny epilogue (B elements): gathers, VLB weighting, batch mean.
    a = alphas_cumprod[timesteps].astype(jnp.float32)
    bt = betas[timesteps].astype(jnp.float32)
    # Note: matches the reference formula exactly; it is infinite at t == 0
    # (1 - a/(1-beta) == 0) by construction.
    w = bt ** 2 / (2.0 * (1.0 - a) * (1.0 - a / (1.0 - bt)) ** 2)
    return jnp.mean(mse * w)


def _vlb_loss_ref(predicted_noise, target_noise, timesteps, x_0, x_t,
                  alphas_cumprod, betas):
    """Pure-JAX reference mirroring the PyTorch forward."""
    del x_0, x_t
    B = predicted_noise.shape[0]
    p = predicted_noise.astype(jnp.float32).reshape(B, -1)
    t = target_noise.astype(jnp.float32).reshape(B, -1)
    mse = jnp.mean((p - t) ** 2, axis=1)
    a = alphas_cumprod[timesteps]
    bt = betas[timesteps]
    w = bt ** 2 / (2.0 * (1.0 - a) * (1.0 - a / (1.0 - bt)) ** 2)
    return jnp.mean(mse * w)


if __name__ == "__main__":
    max_timesteps = 1000
    # Deterministic DDPM schedule (synthetic, not a checkpoint).
    betas = jnp.linspace(1e-4, 0.02, max_timesteps, dtype=jnp.float32)
    alphas_cumprod = jnp.cumprod(1.0 - betas)

    base_key = jax.random.PRNGKey(0)

    def run_case(case_id, shape, **vlb_kwargs):
        k1, k2, k3, k4, k5 = jax.random.split(
            jax.random.fold_in(base_key, case_id), 5)
        pred = jax.random.normal(k1, shape, dtype=jnp.float32)
        tgt = jax.random.normal(k2, shape, dtype=jnp.float32)
        x0 = jax.random.normal(k3, shape, dtype=jnp.float32)
        xt = jax.random.normal(k4, shape, dtype=jnp.float32)
        # t >= 1: the reference VLB weight is infinite at t == 0 by
        # construction; keep the numerical check finite.
        ts = jax.random.randint(k5, (shape[0],), 1, max_timesteps,
                                dtype=jnp.int32)
        out = vlb_loss(pred, tgt, ts, x0, xt, alphas_cumprod, betas,
                       **vlb_kwargs)
        out = jax.block_until_ready(out)
        ref = _vlb_loss_ref(pred, tgt, ts, x0, xt, alphas_cumprod, betas)
        assert jnp.allclose(out, ref, rtol=1e-5, atol=1e-5), (
            shape, vlb_kwargs, out, ref)

    # The module's natural toy shape; force the Pallas path (the auto
    # dispatcher would route something this small to the pure-JAX fallback).
    run_case(0, (2, 4, 16, 16), use_kernel=True)
    # Batch-tiled single-chunk path (K == 1, Bt == B).
    run_case(1, (8, 4, 32, 32), use_kernel=True)
    # Batch tile smaller than B with a ragged batch edge (Bt=2, GB=3, B=5).
    run_case(2, (5, 4, 16, 16), use_kernel=True, target_step_bytes=16 * 1024)
    # Streaming K > 1 path with a masked row tail (rows=40, R=16, K=3).
    run_case(3, (3, 5, 32, 32), use_kernel=True, target_step_bytes=16 * 1024)
    # Default dispatch (tiny problem -> pure-JAX fallback) still works.
    run_case(4, (2, 4, 16, 16))

    print("KERNEL_OK")
</pallas_src>

<mosaic_0001>
module attributes {stable_mosaic.version = 11 : i64} {
  func.func @kernel(%arg0: i32, %arg1: i32, %arg2: memref<2x8x128xf32, #tpu.memory_space<vmem>>, %arg3: memref<2x8x128xf32, #tpu.memory_space<vmem>>, %arg4: memref<1x2x128xf32, #tpu.memory_space<vmem>>, %arg5: memref<2x128xf32, #tpu.memory_space<vmem>>) attributes {dimension_semantics = [#tpu.dimension_semantics<parallel>, #tpu.dimension_semantics<arbitrary>], iteration_bounds = array<i64: 1, 1>, scalar_prefetch = 0 : i64, scratch_operands = 1 : i64, tpu.core_type = #tpu.core_type<tc>, window_params = [{transform_indices = @transform_0, window_bounds = array<i64: 2, 8, 128>}, {transform_indices = @transform_1, window_bounds = array<i64: 2, 8, 128>}, {transform_indices = @transform_2, window_bounds = array<i64: 1, 2, 128>}]} {
    %c0_i32 = arith.constant 0 : i32
    %0 = arith.cmpi eq, %arg1, %c0_i32 : i32
    %1 = arith.extui %0 : i1 to i32
    %c0_i32_0 = arith.constant 0 : i32
    %2 = arith.cmpi ne, %1, %c0_i32_0 : i32
    scf.if %2 {
      %cst_12 = arith.constant 0.000000e+00 : f32
      %14 = vector.broadcast %cst_12 : f32 to vector<2x128xf32>
      %c0_13 = arith.constant 0 : index
      %c0_14 = arith.constant 0 : index
      %15 = vector.load %arg5[%c0_13, %c0_14] : memref<2x128xf32, #tpu.memory_space<vmem>>, vector<2x128xf32>
      tpu.vector_store %arg5[%c0_13, %c0_14], %14 {strides = array<i32>} : memref<2x128xf32, #tpu.memory_space<vmem>>, vector<2x128xf32>,
    } else {
    }
    %c0 = arith.constant 0 : index
    %c0_1 = arith.constant 0 : index
    %c0_2 = arith.constant 0 : index
    %3 = vector.load %arg2[%c0, %c0_1, %c0_2] : memref<2x8x128xf32, #tpu.memory_space<vmem>>, vector<2x8x128xf32>
    %c0_3 = arith.constant 0 : index
    %c0_4 = arith.constant 0 : index
    %c0_5 = arith.constant 0 : index
    %4 = vector.load %arg3[%c0_3, %c0_4, %c0_5] : memref<2x8x128xf32, #tpu.memory_space<vmem>>, vector<2x8x128xf32>
    %5 = arith.subf %3, %4 : vector<2x8x128xf32>
    %6 = arith.mulf %5, %5 : vector<2x8x128xf32>
    %c0_6 = arith.constant 0 : index
    %c0_7 = arith.constant 0 : index
    %7 = vector.load %arg5[%c0_6, %c0_7] : memref<2x128xf32, #tpu.memory_space<vmem>>, vector<2x128xf32>
    %cst = arith.constant dense<0.000000e+00> : vector<2x128xf32>
    %8 = vector.multi_reduction <add>, %6, %cst [1] : vector<2x8x128xf32> to vector<2x128xf32>
    %9 = arith.addf %7, %8 : vector<2x128xf32>
    %c0_8 = arith.constant 0 : index
    %c0_9 = arith.constant 0 : index
    %10 = vector.load %arg5[%c0_8, %c0_9] : memref<2x128xf32, #tpu.memory_space<vmem>>, vector<2x128xf32>
    tpu.vector_store %arg5[%c0_8, %c0_9], %9 {strides = array<i32>} : memref<2x128xf32, #tpu.memory_space<vmem>>, vector<2x128xf32>,
    %c0_i32_10 = arith.constant 0 : i32
    %11 = arith.cmpi eq, %arg1, %c0_i32_10 : i32
    %12 = arith.extui %11 : i1 to i32
    %c0_i32_11 = arith.constant 0 : i32
    %13 = arith.cmpi ne, %12, %c0_i32_11 : i32
    scf.if %13 {
      %c0_12 = arith.constant 0 : index
      %c0_13 = arith.constant 0 : index
      %14 = vector.load %arg5[%c0_12, %c0_13] : memref<2x128xf32, #tpu.memory_space<vmem>>, vector<2x128xf32>
      %c0_14 = arith.constant 0 : index
      %c0_15 = arith.constant 0 : index
      %c0_16 = arith.constant 0 : index
      %15 = vector.load %arg4[%c0_14, %c0_15, %c0_16] : memref<1x2x128xf32, #tpu.memory_space<vmem>>, vector<1x2x128xf32>
      %16 = vector.shape_cast %15 : vector<1x2x128xf32> to vector<2x128xf32>
      %17 = vector.shape_cast %14 : vector<2x128xf32> to vector<1x2x128xf32>
      tpu.vector_store %arg4[%c0_14, %c0_15, %c0_16], %17 {strides = array<i32>} : memref<1x2x128xf32, #tpu.memory_space<vmem>>, vector<1x2x128xf32>,
    } else {
    }
    return
  }
  func.func @transform_0(%arg0: i32, %arg1: i32) -> (i32, i32, i32) {
    %c0_i32 = arith.constant 0 : i32
    %c0_i32_0 = arith.constant 0 : i32
    return %arg0, %arg1, %c0_i32 : i32, i32, i32
  }
  func.func @transform_1(%arg0: i32, %arg1: i32) -> (i32, i32, i32) {
    %c0_i32 = arith.constant 0 : i32
    %c0_i32_0 = arith.constant 0 : i32
    return %arg0, %arg1, %c0_i32 : i32, i32, i32
  }
  func.func @transform_2(%arg0: i32, %arg1: i32) -> (i32, i32, i32) {
    %c0_i32 = arith.constant 0 : i32
    %c0_i32_0 = arith.constant 0 : i32
    %c0_i32_1 = arith.constant 0 : i32
    return %arg0, %c0_i32, %c0_i32_0 : i32, i32, i32
  }
}

</mosaic_0001>

<bundles_post_ra>
// kernel: tpu_custom_call.1
= control target key start
LH: loop header
LB: loop body
LE: loop exit
PB: predicated region body
PF: predicated region fallthrough
CT: control target
= control target key end

     0   :  { %7 = vsyncpa [#allocation4], 0  ;;  %s214_s0 = inlined_call_operand.hbm [shape: f32[2,8,128], index: 0, kind: input, shape index: {}]   ;;  %s215_s1 = inlined_call_operand.hbm [shape: f32[2,8,128], index: 1, kind: input, shape index: {}]   ;;  %s216_s2 = inlined_call_operand.hbm [shape: f32[1,2,128], index: 2, kind: output, shape index: {}]  }
   0x1   :  { %8 = vsyncpa [#allocation7], 0 }
   0x2   :  { %9 = vsyncpa [#allocation5], 0  ;;  %s14_s11 = sshll.u32 %s214_s0, 4  ;;  %s184_s12 = smov [#allocation3]   ;;  %s15_s11 = int_to_ptr.hbm [resolvable:$true] %s14_s11 }
   0x3   :  { %s16_s13 = sshll.u32 %s184_s12, 4  ;;  %s27_s16 = sshll.u32 %s215_s1, 4  ;;  %s17_s13 = int_to_ptr.vmem [resolvable:$true] %s16_s13  ;;  %s28_s16 = int_to_ptr.hbm [resolvable:$true] %s27_s16 }
   0x4   :  { %s185_s17 = smov 128   ;;  %s186_s18 = smov 8  }
   0x5   :  { %22 = dma.hbm_to_vmem [thread:$0]  %s15_s11, 256, %s17_s13, [#allocation4], %s185_s17, %s185_s17, %s186_s18  }
   0x6   :  { %s187_s19 = smov [#allocation6]  }
   0x7   :  { %s29_s20 = sshll.u32 %s187_s19, 4  ;;  %s30_s20 = int_to_ptr.vmem [resolvable:$true] %s29_s20 }
   0x8   :  { %35 = dma.hbm_to_vmem [thread:$0]  %s28_s16, 256, %s30_s20, [#allocation7], %s185_s17, %s185_s17, %s186_s18  }
   0x9   :  { %178 = dma.done.wait [#allocation4], 256  }
   0xa   :  { %179 = vsyncadd [#allocation4], 4294967040 }
   0xb   :  { %180 = dma.done.wait [#allocation7], 256  }
   0xc   :  { %181 = vsyncadd [#allocation7], 4294967040  ;;  %v188_v0 = vmov 0.0   ;;  %v49_v1 = vld [vmem:[#allocation3] sm:$0xff]  ;;  %v50_v2 = vld [vmem:[#allocation3 + $0x8] sm:$0xff]  ;;  %vm72_vm0 = vcmask 1041409  }
   0xd   :  { %48 = vst [vmem:[#allocation2] sm:$0x3] %v188_v0  ;;  %v51_v3 = vld [vmem:[#allocation6] sm:$0xff]  ;;  %v52_v4 = vld [vmem:[#allocation6 + $0x8] sm:$0xff]  ;;  %s189_s0 = smov [#allocation8]   ;;  %s89_s23 = sshll.u32 %s216_s2, 4  ;;  %s90_s23 = int_to_ptr.hbm [resolvable:$true] %s89_s23 }
   0xe   :  { %v53_v5 = vsub.f32 %v49_v1, %v51_v3  ;;  %v54_v6 = vsub.f32 %v50_v2, %v52_v4  ;;  %s87_s1 = sshll.u32 %s189_s0, 4  ;;  %s88_s1 = int_to_ptr.vmem [resolvable:$true] %s87_s1 }
  0x10   :  { %v55_v7 = vmul.f32 %v53_v5, %v53_v5  ;;  %v56_v8 = vmul.f32 %v54_v6, %v54_v6 }
  0x12   :  { %v58_v9 = vrot.slane %v55_v7, 4  ;;  %v64_v10 = vrot.slane %v56_v8, 4 }
  0x14   :  { %v59_v11 = vadd.f32 %v58_v9, %v55_v7  ;;  %v65_v12 = vadd.f32 %v64_v10, %v56_v8  ;;  %v57_v20 = vld [vmem:[#allocation2] sm:$0x3] }
  0x16   :  { %v60_v13 = vrot.slane %v59_v11, 2  ;;  %v66_v14 = vrot.slane %v65_v12, 2 }
  0x18   :  { %v61_v15 = vadd.f32 %v60_v13, %v59_v11  ;;  %v67_v16 = vadd.f32 %v66_v14, %v65_v12 }
  0x1a   :  { %v62_v17 = vrot.slane %v61_v15, 1  ;;  %v68_v18 = vrot.slane %v67_v16, 1 }
  0x1c   :  { %v63_v19 = vadd.f32 %v62_v17, %v61_v15  ;;  %v69_v21 = vadd.f32 %v68_v18, %v67_v16 }
  0x1e   :  { %v73_v22 = vsel %vm72_vm0, %v69_v21, %v63_v19 }
  0x1f   :  { %v75_v23 = vadd.f32 %v73_v22, %v57_v20 }
  0x21   :  { %76 = vst [vmem:[#allocation2] sm:$0x3] %v75_v23 }
  0x28   :  { %v80_v24 = vld [vmem:[#allocation2] sm:$0x3] }
  0x29   :  { %81 = vst [vmem:[#allocation8] sm:$0x3] %v80_v24 }
  0x2a   :  { %92 = dma.vmem_to_hbm [thread:$0]  %s88_s1, 32, %s90_s23, [#allocation5]  }
  0x2b   :  { %182 = dma.done.wait [#allocation5], 32  }
  0x2c   :  { %183 = vsyncadd [#allocation5], 4294967264 }
  0x2d   :  { %97 = vsyncpa [#allocation4], 1 }
  0x2e   :  { %98 = vsyncpa [#allocation7], 1 }
  0x2f   :  { %99 = vsyncpa [#allocation5], 1 }

</bundles_post_ra>
